<compile_context>
chip_gen: v7x
topology: tpu7x:2x2x1
jax: 0.10.0
libtpu: 0.0.40
codegen_flags: <defaults>
</compile_context>

<pallas_src>
import functools

import jax
import jax.numpy as jnp
from jax.experimental import pallas as pl
from jax.experimental.pallas import tpu as pltpu


# ----------------------------------------------------------------------------
# Sizing helpers (padding- and generation-aware)
# ----------------------------------------------------------------------------

def _round_up(x, m):
    return -(-x // m) * m


def _sublane_tile(dtype):
    """Second-to-last dim tile: 8 for f32, 16 for bf16, 32 for int8/fp8."""
    itemsize = jnp.dtype(dtype).itemsize
    return 8 * max(1, 4 // itemsize)


def _padded_slab_bytes(d1, d2, dtype):
    """VMEM bytes of a (d1, d2) tile after (sublane, lane) layout padding."""
    itemsize = jnp.dtype(dtype).itemsize
    return _round_up(d1, _sublane_tile(dtype)) * _round_up(d2, 128) * itemsize


@functools.lru_cache(maxsize=None)
def _chip_config():
    """(vmem_limit_bytes, block_budget_bytes, min_steps, multi_core)."""
    vmem_cap = None
    try:
        info = pltpu.get_tpu_info()
        vmem_cap = int(getattr(info, "vmem_capacity_bytes", 0)) or None
    except Exception:
        vmem_cap = None
    kind = ""
    try:
        kind = jax.devices()[0].device_kind.lower()
    except Exception:
        pass
    if vmem_cap is None:
        vmem_cap = 64 << 20                       # unknown -> assume smallest (v7x-class)
    if "v7" in kind:
        vmem_cap = min(vmem_cap, 64 << 20)        # per-TensorCore VMEM on v7x
    multi_core = ("v7" in kind) or (vmem_cap <= (96 << 20))
    limit = min(int(vmem_cap * 0.78), 100 << 20)  # headroom for compiler scratch
    limit = max((limit // (1 << 20)) << 20, 32 << 20)
    budget = limit // 2                           # for the 4x (in+out, 2-buffered) x blocks
    min_steps = 4 if multi_core else 2            # 1-TC chips only need double-buffer overlap
    return limit, budget, min_steps, multi_core


def _pick_block_batch(batch, per_image_bytes, avail_bytes, *, min_steps, even_steps):
    """Largest per-step batch tile Bt that fits the budget, keeps >= min_steps
    grid steps when the batch allows, and (on multi-core chips) prefers an even
    step count so both TensorCores get equal work."""
    max_bt_budget = max(1, avail_bytes // (4 * per_image_bytes))
    max_bt_steps = max(1, batch // min(min_steps, batch))
    bt = int(min(batch, max_bt_budget, max_bt_steps))
    if even_steps:
        steps = pl.cdiv(batch, bt)
        if steps > 1 and steps % 2 == 1:
            for cand in range(bt - 1, max(bt // 2, 1) - 1, -1):
                if pl.cdiv(batch, cand) % 2 == 0:
                    bt = cand
                    break
    return bt


def _pick_hw_tile(hw, ch, dtype, budget, channels_last, override=None):
    """Spatial tile for the two-pass fallback (pass 2: 2x in + 2x out buffers)."""
    unit = _sublane_tile(dtype) if channels_last else 128
    if override is not None:
        t = int(override)
    else:
        itemsize = jnp.dtype(dtype).itemsize
        if channels_last:
            per_row = _round_up(ch, 128) * itemsize          # one spatial row (C on lanes)
        else:
            per_row = _round_up(ch, _sublane_tile(dtype)) * itemsize  # one spatial column
        t = max(unit, budget // (4 * per_row))
    if t >= hw:
        return hw
    t = max(unit, (t // unit) * unit)
    return hw if t >= hw else t


# ----------------------------------------------------------------------------
# Kernels
# ----------------------------------------------------------------------------

def _se_kernel(x_ref, w1t_ref, w2t_ref, o_ref, *, channels_last, inv_hw):
    """Single-pass SE: squeeze + excite + scale for a (Bt, ...) block."""
    x = x_ref[...]                       # (Bt, HW, C) or (Bt, C, HW), native dtype
    bt = x.shape[0]

    # --- squeeze: spatial mean, f32 accumulation ------------------------------
    if channels_last:
        # Channels on lanes: sublane-axis sum on the VPU with f32 accumulation
        # (no Bt separate M=1 MXU matmuls, no materialized f32 block copy).
        y = jnp.sum(x, axis=1, dtype=jnp.float32) * inv_hw            # (Bt, C)
    elif x.dtype == jnp.float32:
        y = jnp.sum(x, axis=2) * inv_hw                               # lane (XLU) reduce
    else:
        # Sub-f32 NCHW: contract the lane (spatial) axis against ones on the MXU
        # with f32 accumulation instead of materializing an f32 copy of the block.
        ones = jnp.ones((bt, x.shape[2], 1), dtype=x.dtype)
        y = jnp.einsum("bch,bhk->bck", x, ones,
                       preferred_element_type=jnp.float32).reshape(bt, -1) * inv_hw

    # --- excitation: fc1 -> relu -> fc2 -> sigmoid (M = Bt rows on the MXU) ---
    w1t = w1t_ref[...]                                                # (C, C//r)
    w2t = w2t_ref[...]                                                # (C//r, C)
    h = jnp.maximum(jnp.dot(y.astype(w1t.dtype), w1t,
                            preferred_element_type=jnp.float32), 0.0)
    z = jnp.dot(h.astype(w2t.dtype), w2t, preferred_element_type=jnp.float32)
    # Approx reciprocal rides the EUP slot; keep the exact path for f32 outputs
    # so the gate stays bit-close to the f32 reference.
    s = pl.reciprocal(1.0 + jnp.exp(-z), approx=x.dtype != jnp.float32)

    # --- scale: broadcast the per-channel gate over the spatial axis ----------
    s = s.astype(x.dtype)              # gating multiply in the native dtype
    if channels_last:
        o_ref[...] = (x * s[:, None, :]).astype(o_ref.dtype)          # sublane bcast
    else:
        o_ref[...] = (x * s[:, :, None]).astype(o_ref.dtype)          # lane bcast


def _se_gate_kernel(x_ref, w1t_ref, w2t_ref, g_ref, acc_ref, *,
                    channels_last, inv_hw, total_hw, hw_tile):
    """Two-pass fallback, pass 1: accumulate per-channel sums over HW tiles,
    then compute the (1, C) gate on the last spatial step."""
    h_idx = pl.program_id(1)

    @pl.when(h_idx == 0)
    def _():
        acc_ref[...] = jnp.zeros_like(acc_ref)

    x = x_ref[...]                       # (1, hw_t, C) or (1, C, hw_t)
    sp_axis = 1 if channels_last else 2
    if total_hw % hw_tile != 0:
        # Mask out-of-range spatial positions of the partial trailing tile so
        # padded garbage never pollutes the running sum.
        idx = jax.lax.broadcasted_iota(jnp.int32, x.shape, sp_axis)
        x = jnp.where(h_idx * hw_tile + idx < total_hw, x, jnp.zeros_like(x))

    if channels_last:
        part = jnp.sum(x, axis=1, dtype=jnp.float32)                  # (1, C)
    elif x.dtype == jnp.float32:
        part = jnp.sum(x, axis=2)                                     # (1, C)
    else:
        ones = jnp.ones((x.shape[0], x.shape[2], 1), dtype=x.dtype)
        part = jnp.einsum("bch,bhk->bck", x, ones,
                          preferred_element_type=jnp.float32).reshape(1, -1)
    acc_ref[...] += part

    @pl.when(h_idx == pl.num_programs(1) - 1)
    def _():
        y = acc_ref[...] * inv_hw                                     # (1, C) f32
        w1t = w1t_ref[...]
        w2t = w2t_ref[...]
        hdn = jnp.maximum(jnp.dot(y.astype(w1t.dtype), w1t,
                                  preferred_element_type=jnp.float32), 0.0)
        z = jnp.dot(hdn.astype(w2t.dtype), w2t, preferred_element_type=jnp.float32)
        g = pl.reciprocal(1.0 + jnp.exp(-z), approx=x_ref.dtype != jnp.float32)
        g_ref[...] = g.reshape(g_ref.shape)


def _se_scale_kernel(x_ref, g_ref, o_ref):
    """Two-pass fallback, pass 2: out = x * gate (gate has a spatial singleton)."""
    x = x_ref[...]
    s = g_ref[...].astype(x.dtype)        # (1, 1, C) or (1, C, 1)
    o_ref[...] = (x * s).astype(o_ref.dtype)


# ----------------------------------------------------------------------------
# pallas_call wrappers
# ----------------------------------------------------------------------------

def _se_two_pass(x3, w1_t, w2_t, *, channels_last, limit, budget, hw_tile=None):
    """Fallback when one (C, H*W) slab does not fit VMEM: read x twice."""
    B, d1, d2 = x3.shape
    if channels_last:
        hw, ch = d1, d2
    else:
        ch, hw = d1, d2
    hid = w1_t.shape[1]
    hw_t = _pick_hw_tile(hw, ch, x3.dtype, budget, channels_last, override=hw_tile)
    n_hw = pl.cdiv(hw, hw_t)

    if channels_last:
        x_spec = pl.BlockSpec((1, hw_t, ch), lambda b, h: (b, h, 0))
        gate_shape = (B, 1, ch)
        g_spec = pl.BlockSpec((1, 1, ch), lambda b, h: (b, 0, 0))
    else:
        x_spec = pl.BlockSpec((1, ch, hw_t), lambda b, h: (b, 0, h))
        gate_shape = (B, ch, 1)
        g_spec = pl.BlockSpec((1, ch, 1), lambda b, h: (b, 0, 0))

    # Pass 1: squeeze (HW-tiled accumulation) + excitation -> per-image gate.
    gate = pl.pallas_call(
        functools.partial(_se_gate_kernel, channels_last=channels_last,
                          inv_hw=1.0 / hw, total_hw=hw, hw_tile=hw_t),
        out_shape=jax.ShapeDtypeStruct(gate_shape, jnp.float32),
        grid_spec=pltpu.PrefetchScalarGridSpec(
            num_scalar_prefetch=0,
            grid=(B, n_hw),
            in_specs=[x_spec,
                      pl.BlockSpec((ch, hid), lambda b, h: (0, 0)),
                      pl.BlockSpec((hid, ch), lambda b, h: (0, 0))],
            out_specs=g_spec,
            scratch_shapes=[pltpu.VMEM((1, ch), jnp.float32)],
        ),
        compiler_params=pltpu.CompilerParams(
            dimension_semantics=("parallel", "arbitrary"),
            vmem_limit_bytes=limit,
        ),
    )(x3, w1_t, w2_t)

    # Pass 2: HW-tiled scale.
    return pl.pallas_call(
        _se_scale_kernel,
        out_shape=jax.ShapeDtypeStruct(x3.shape, x3.dtype),
        grid_spec=pltpu.PrefetchScalarGridSpec(
            num_scalar_prefetch=0,
            grid=(B, n_hw),
            in_specs=[x_spec, g_spec],
            out_specs=x_spec,
        ),
        compiler_params=pltpu.CompilerParams(
            dimension_semantics=("parallel", "parallel"),
            vmem_limit_bytes=limit,
        ),
    )(x3, gate)


def _se_call(x3, w1_t, w2_t, *, channels_last, force_two_pass=False, hw_tile=None):
    """x3: (B, HW, C) if channels_last else (B, C, HW)."""
    B, d1, d2 = x3.shape
    if channels_last:
        hw, ch = d1, d2
    else:
        ch, hw = d1, d2
    hid = w1_t.shape[1]
    assert w1_t.shape == (ch, hid) and w2_t.shape == (hid, ch), "weight layout mismatch"

    limit, budget, min_steps, multi_core = _chip_config()
    per_image = _padded_slab_bytes(d1, d2, x3.dtype)          # padding-aware bytes
    weight_bytes = 2 * (_padded_slab_bytes(ch, hid, w1_t.dtype)
                        + _padded_slab_bytes(hid, ch, w2_t.dtype))
    avail = budget - weight_bytes

    if force_two_pass or avail < 4 * per_image:
        return _se_two_pass(x3, w1_t, w2_t, channels_last=channels_last,
                            limit=limit, budget=budget, hw_tile=hw_tile)

    bt = _pick_block_batch(B, per_image, avail, min_steps=min_steps,
                           even_steps=multi_core)
    kernel = functools.partial(_se_kernel, channels_last=channels_last, inv_hw=1.0 / hw)

    return pl.pallas_call(
        kernel,
        out_shape=jax.ShapeDtypeStruct(x3.shape, x3.dtype),
        grid_spec=pltpu.PrefetchScalarGridSpec(
            num_scalar_prefetch=0,
            grid=(pl.cdiv(B, bt),),                           # partial trailing block OK
            in_specs=[
                pl.BlockSpec((bt, d1, d2), lambda i: (i, 0, 0)),
                pl.BlockSpec((ch, hid), lambda i: (0, 0)),    # constant block: fetched once
                pl.BlockSpec((hid, ch), lambda i: (0, 0)),
            ],
            out_specs=pl.BlockSpec((bt, d1, d2), lambda i: (i, 0, 0)),
        ),
        compiler_params=pltpu.CompilerParams(
            dimension_semantics=("parallel",),                # batch grid: megacore-splittable
            vmem_limit_bytes=limit,
        ),
    )(x3, w1_t, w2_t)


# ----------------------------------------------------------------------------
# Public API
# ----------------------------------------------------------------------------

def prepare_se_weights(w1, w2):
    """One-time conversion of PyTorch Linear weights (out_features, in_features)
    into the kernel's matmul layout.  Hoist this out of the per-call path."""
    return jnp.asarray(w1).T, jnp.asarray(w2).T               # (C, C//r), (C//r, C)


def se_layer_nchw(x, w1_t, w2_t, *, force_two_pass=False, hw_tile=None):
    """x: (B, C, H, W) -> (B, C, H, W).  Spatial on lanes; no transpose of x."""
    B, C, H, W = x.shape
    out3 = _se_call(x.reshape(B, C, H * W), w1_t, w2_t, channels_last=False,
                    force_two_pass=force_two_pass, hw_tile=hw_tile)
    return out3.reshape(B, C, H, W)


def se_layer_nhwc(x, w1_t, w2_t, *, force_two_pass=False, hw_tile=None):
    """x: (B, H, W, C) -> (B, H, W, C).  Lane-dense when C % 128 == 0; prefer
    this entry point when the surrounding network keeps NHWC activations."""
    B, H, W, C = x.shape
    out3 = _se_call(x.reshape(B, H * W, C), w1_t, w2_t, channels_last=True,
                    force_two_pass=force_two_pass, hw_tile=hw_tile)
    return out3.reshape(B, H, W, C)


def se_layer_ref(x_nchw, w1, w2):
    """Pure-JAX reference matching the PyTorch SELayer (NCHW, PyTorch weights)."""
    y = jnp.mean(x_nchw, axis=(2, 3))                         # (B, C)
    h = jnp.maximum(y @ w1.T, 0.0)                            # (B, C//r)
    s = jax.nn.sigmoid(h @ w2.T)                              # (B, C)
    return x_nchw * s[:, :, None, None]


# ----------------------------------------------------------------------------
# Self-test
# ----------------------------------------------------------------------------

if __name__ == "__main__":
    key = jax.random.PRNGKey(0)
    reduction = 16

    def make_case(key, b, c, h, w, dtype):
        kx, k1, k2, key = jax.random.split(key, 4)
        hid = max(1, c // reduction)
        x = jax.random.normal(kx, (b, c, h, w), dtype=jnp.float32).astype(dtype)
        w1 = jax.random.normal(k1, (hid, c), dtype=jnp.float32) / jnp.sqrt(c)
        w2 = jax.random.normal(k2, (c, hid), dtype=jnp.float32) / jnp.sqrt(hid)
        return key, x, w1, w2

    def check(out_nchw, x_nchw, w1, w2, atol, rtol, name):
        ref = se_layer_ref(x_nchw.astype(jnp.float32), w1, w2)
        assert out_nchw.shape == ref.shape, f"{name}: shape mismatch"
        assert jnp.allclose(out_nchw.astype(jnp.float32), ref, atol=atol, rtol=rtol), \
            f"{name}: value mismatch vs reference"

    # 1. NCHW f32 (C not lane-aligned, spatial on lanes), single-pass path.
    key, x, w1, w2 = make_case(key, 2, 32, 16, 16, jnp.float32)
    w1_t, w2_t = prepare_se_weights(w1, w2)
    out = jax.block_until_ready(se_layer_nchw(x, w1_t, w2_t))
    check(out, x, w1, w2, 1e-5, 1e-5, "nchw_f32")

    # 2. NHWC f32, non-divisible batch (partial trailing block), lane-dense C.
    key, x, w1, w2 = make_case(key, 5, 128, 7, 7, jnp.float32)
    w1_t, w2_t = prepare_se_weights(w1, w2)
    out = se_layer_nhwc(jnp.transpose(x, (0, 2, 3, 1)), w1_t, w2_t)
    out = jax.block_until_ready(jnp.transpose(out, (0, 3, 1, 2)))
    check(out, x, w1, w2, 1e-5, 1e-5, "nhwc_f32_partial_batch")

    # 3. NHWC bf16: sublane f32-accumulating squeeze + bf16 gating.
    key, x, w1, w2 = make_case(key, 4, 128, 8, 8, jnp.bfloat16)
    w1_t, w2_t = prepare_se_weights(w1, w2)
    out = se_layer_nhwc(jnp.transpose(x, (0, 2, 3, 1)), w1_t, w2_t)
    out = jax.block_until_ready(jnp.transpose(out, (0, 3, 1, 2)))
    check(out, x, w1, w2, 5e-2, 5e-2, "nhwc_bf16")

    # 4. NCHW bf16: MXU ones-contraction squeeze.
    key, x, w1, w2 = make_case(key, 2, 32, 16, 16, jnp.bfloat16)
    w1_t, w2_t = prepare_se_weights(w1, w2)
    out = jax.block_until_ready(se_layer_nchw(x, w1_t, w2_t))
    check(out, x, w1, w2, 5e-2, 5e-2, "nchw_bf16")

    # 5. Two-pass fallback, NCHW f32, HW tiled with a masked partial lane tile.
    key, x, w1, w2 = make_case(key, 2, 32, 12, 16, jnp.float32)
    w1_t, w2_t = prepare_se_weights(w1, w2)
    out = jax.block_until_ready(
        se_layer_nchw(x, w1_t, w2_t, force_two_pass=True, hw_tile=128))
    check(out, x, w1, w2, 1e-5, 1e-5, "nchw_f32_two_pass")

    # 6. Two-pass fallback, NHWC bf16, masked partial sublane tile.
    key, x, w1, w2 = make_case(key, 2, 128, 7, 7, jnp.bfloat16)
    w1_t, w2_t = prepare_se_weights(w1, w2)
    out = se_layer_nhwc(jnp.transpose(x, (0, 2, 3, 1)), w1_t, w2_t,
                        force_two_pass=True, hw_tile=16)
    out = jax.block_until_ready(jnp.transpose(out, (0, 3, 1, 2)))
    check(out, x, w1, w2, 5e-2, 5e-2, "nhwc_bf16_two_pass")

    print("KERNEL_OK")
</pallas_src>

<mosaic_0001>
module attributes {stable_mosaic.version = 11 : i64} {
  func.func @_se_kernel(%arg0: i32, %arg1: memref<1x32x256xf32, #tpu.memory_space<vmem>>, %arg2: memref<32x2xf32, #tpu.memory_space<vmem>>, %arg3: memref<2x32xf32, #tpu.memory_space<vmem>>, %arg4: memref<1x32x256xf32, #tpu.memory_space<vmem>>) attributes {dimension_semantics = [#tpu.dimension_semantics<parallel>], iteration_bounds = array<i64: 2>, scalar_prefetch = 0 : i64, scratch_operands = 0 : i64, tpu.core_type = #tpu.core_type<tc>, window_params = [{transform_indices = @transform_0, window_bounds = array<i64: 1, 32, 256>}, {pipeline_mode = #tpu.pipeline_mode<synchronous>, transform_indices = @transform_1, window_bounds = array<i64: 32, 2>}, {pipeline_mode = #tpu.pipeline_mode<synchronous>, transform_indices = @transform_2, window_bounds = array<i64: 2, 32>}, {transform_indices = @transform_3, window_bounds = array<i64: 1, 32, 256>}]} {
    %c0 = arith.constant 0 : index
    %c0_0 = arith.constant 0 : index
    %c0_1 = arith.constant 0 : index
    %0 = vector.load %arg1[%c0, %c0_0, %c0_1] : memref<1x32x256xf32, #tpu.memory_space<vmem>>, vector<1x32x256xf32>
    %cst = arith.constant dense<0.000000e+00> : vector<1x32xf32>
    %1 = vector.multi_reduction <add>, %0, %cst [2] : vector<1x32x256xf32> to vector<1x32xf32>
    %cst_2 = arith.constant 3.906250e-03 : f32
    %2 = vector.broadcast %cst_2 : f32 to vector<1x32xf32>
    %3 = arith.mulf %1, %2 : vector<1x32xf32>
    %c0_3 = arith.constant 0 : index
    %c0_4 = arith.constant 0 : index
    %4 = vector.load %arg2[%c0_3, %c0_4] : memref<32x2xf32, #tpu.memory_space<vmem>>, vector<32x2xf32>
    %c0_5 = arith.constant 0 : index
    %c0_6 = arith.constant 0 : index
    %5 = vector.load %arg3[%c0_5, %c0_6] : memref<2x32xf32, #tpu.memory_space<vmem>>, vector<2x32xf32>
    %cst_7 = arith.constant dense<0.000000e+00> : vector<1x2xf32>
    %6 = tpu.matmul %3, %4, %cst_7 {dimension_numbers = #tpu.dot_dimension_numbers<[1], [0], [0], [1], [0, 0, 1, 1], [], []>} : vector<1x32xf32>, vector<32x2xf32>, vector<1x2xf32> -> vector<1x2xf32>
    %cst_8 = arith.constant 0.000000e+00 : f32
    %7 = vector.broadcast %cst_8 : f32 to vector<1x2xf32>
    %8 = arith.maximumf %6, %7 : vector<1x2xf32>
    %cst_9 = arith.constant dense<0.000000e+00> : vector<1x32xf32>
    %9 = tpu.matmul %8, %5, %cst_9 {dimension_numbers = #tpu.dot_dimension_numbers<[1], [0], [0], [1], [0, 0, 1, 1], [], []>} : vector<1x2xf32>, vector<2x32xf32>, vector<1x32xf32> -> vector<1x32xf32>
    %cst_10 = arith.constant 0.000000e+00 : f32
    %10 = vector.broadcast %cst_10 : f32 to vector<1x32xf32>
    %11 = arith.subf %10, %9 : vector<1x32xf32>
    %12 = math.exp %11 : vector<1x32xf32>
    %cst_11 = arith.constant 1.000000e+00 : f32
    %13 = vector.broadcast %cst_11 : f32 to vector<1x32xf32>
    %14 = arith.addf %13, %12 : vector<1x32xf32>
    %15 = tpu.reciprocal %14 : vector<1x32xf32> -> vector<1x32xf32>
    %16 = vector.shape_cast %15 : vector<1x32xf32> to vector<1x32x1xf32>
    %17 = vector.broadcast %16 : vector<1x32x1xf32> to vector<1x32x256xf32>
    %18 = arith.mulf %0, %17 : vector<1x32x256xf32>
    %c0_12 = arith.constant 0 : index
    %c0_13 = arith.constant 0 : index
    %c0_14 = arith.constant 0 : index
    %19 = vector.load %arg4[%c0_12, %c0_13, %c0_14] : memref<1x32x256xf32, #tpu.memory_space<vmem>>, vector<1x32x256xf32>
    tpu.vector_store %arg4[%c0_12, %c0_13, %c0_14], %18 {strides = array<i32>} : memref<1x32x256xf32, #tpu.memory_space<vmem>>, vector<1x32x256xf32>,
    return
  }
  func.func @transform_0(%arg0: i32) -> (i32, i32, i32) {
    %c0_i32 = arith.constant 0 : i32
    %c0_i32_0 = arith.constant 0 : i32
    %c0_i32_1 = arith.constant 0 : i32
    return %arg0, %c0_i32, %c0_i32_0 : i32, i32, i32
  }
  func.func @transform_1(%arg0: i32) -> (i32, i32) {
    %c0_i32 = arith.constant 0 : i32
    %c0_i32_0 = arith.constant 0 : i32
    %c0_i32_1 = arith.constant 0 : i32
    return %c0_i32, %c0_i32_0 : i32, i32
  }
  func.func @transform_2(%arg0: i32) -> (i32, i32) {
    %c0_i32 = arith.constant 0 : i32
    %c0_i32_0 = arith.constant 0 : i32
    %c0_i32_1 = arith.constant 0 : i32
    return %c0_i32, %c0_i32_0 : i32, i32
  }
  func.func @transform_3(%arg0: i32) -> (i32, i32, i32) {
    %c0_i32 = arith.constant 0 : i32
    %c0_i32_0 = arith.constant 0 : i32
    %c0_i32_1 = arith.constant 0 : i32
    return %arg0, %c0_i32, %c0_i32_0 : i32, i32, i32
  }
}

</mosaic_0001>

<bundles_post_ra>
// kernel: tpu_custom_call.1
= control target key start
LH: loop header
LB: loop body
LE: loop exit
PB: predicated region body
PF: predicated region fallthrough
CT: control target
= control target key end

     0   :  { %8 = vsyncpa [#allocation3], 0  ;;  %s973_s0 = inlined_call_operand.hbm [shape: f32[2,32,256], index: 0, kind: input, shape index: {}]   ;;  %s974_s1 = inlined_call_operand.vmem [shape: f32[32,2], index: 1, kind: input, shape index: {}]   ;;  %s975_s2 = inlined_call_operand.vmem [shape: f32[2,32], index: 2, kind: input, shape index: {}]   ;;  %s976_s3 = inlined_call_operand.hbm [shape: f32[2,32,256], index: 3, kind: output, shape index: {}]  }
   0x1   :  { %10 = vsyncpa [#allocation3 + $0x1], 0 }
   0x2   :  { %11 = vsyncpa [#allocation4], 0 }
   0x3   :  { %13 = vsyncpa [#allocation4 + $0x1], 0  ;;  %s760_s12 = smov 0   ;;  %s762_s13 = smov 0  }
   0x4   :  { %s764_s14 = smov 0   ;;  %s766_s15 = smov 0  }
   0x5 LB: > { %s781_s16 = sadd.s32 4294967295, %s729_s15   ;;  %s528_s17 = sadd.s32 4294967294, %s729_s15   ;;  %s729_s15 = sphi %s766_s15, %s989_s15   ;;  %s725_s14 = sphi %s764_s14, %s988_s14   ;;  %s721_s13 = sphi %s762_s13, %s987_s13   ;;  %s717_s12 = sphi %s760_s12, %s986_s12  }
   0x6   : > { %s785_s18 = sadd.s32 1, %s729_s15   ;;  %s26_s19 = sadd.s32 1, %s725_s14 }
   0x7   : > { %s23_s20 = ssub.s32 %s729_s15, %s785_s18  ;;  %p33_p0 = scmp.ne.s32.totalorder %s725_s14, %s721_s13 }
   0x8   : > { %p24_p1 = scmp.eq.s32.totalorder %s23_s20, 0  ;;  %p34_p2 = scmp.eq.s32.totalorder %s729_s15, 0 }
   0x9   : > { %p39_p3 = scmp.ne.s32.totalorder %s721_s13, %s717_s12  ;;  %p40_p4 = scmp.eq.s32.totalorder %s781_s16, 0 }
   0xa   : > { %s797_s21 = scalar_select %p24_p1, %s725_s14, %s26_s19  }
   0xb   : > { %p799_p5 = por %p34_p2, %p33_p0  ;;  %p803_p6 = por %p40_p4, %p39_p3 }
   0xc   : > { %p105_p7 = scmp.eq.s32.totalorder %s781_s16, 1  ;;  %p111_p8 = scmp.eq.s32.totalorder %s528_s17, 1 }
   0xd   : > { %p588_p10 = scmp.lt.s32.totalorder %s729_s15, 2  ;;  %s137_s26 = sand.u32 1, %s725_s14  }
   0xe   : > { %p810_p11 = por %p105_p7, %p33_p0  ;;  %p814_p12 = por %p111_p8, %p39_p3 }
   0xf   : > { %s545_s27 = sshll.u32 %s729_s15, 10  ;;  %s531_s28 = sshll.u32 %s137_s26, 6 }
  0x10   : > { %s980_s24 = scalar_select %p810_p11, 1, 0 }
  0x11   : > { %s981_s25 = scalar_select %p814_p12, 1, 0 }
  0x12   : > { %s823_s4 = scalar_lea.hbm %s973_s0, %s545_s27  ;;  %s141_s5 = scalar_lea.vmem [#allocation2], %s531_s28 }
  0x13   : > { %s148_s6 = sshll.u32 %s141_s5, 4  ;;  %p827_p13 = pnand %p588_p10, %p799_p5  ;;  %s831_s6 = int_to_ptr.vmem [resolvable:$true] %s148_s6 }
  0x14   : > { %s833_s8 = scalar_lea.sflag [#allocation3], %s137_s26  ;;  %s633_s9 = scalar_lea.hbm %s823_s4, 1024 }
  0x15   : > { %p634_p0 = scmp.ne.s32.totalorder %s823_s4, %s633_s9  ;;  %p635_p1 = pneg %p827_p13 }
  0x16   : > { %s638_s17 = scalar_lea.hbm %s973_s0, 2048  ;;  %p639_p4 = scmp.lt.u32.totalorder %s823_s4, %s973_s0 }
  0x17   : > { %p636_p2 = pnand %p635_p1, %p634_p0  ;;  %p640_p5 = scmp.lt.u32.totalorder %s638_s17, %s633_s9 }
  0x18   : > { %p642_p8 = scmp.lt.u32.totalorder %s633_s9, %s823_s4 }
  0x19   : > { %p637_p3 = pneg %p636_p2  ;;  %p641_p7 = por %p640_p5, %p639_p4 }
  0x1b   : > { %p643_p10 = por %p642_p8, %p641_p7 }
  0x1d   : > { %p644_p9 = pnand %p643_p10, %p637_p3 }
  0x1f   : > { %647 = shalt.err (!%p644_p9)
}
  0x20   : > { %s648_s22 = scalar_lea.vmem %s831_s6, 1024  ;;  %s731_s26 = smov [#allocation2]  }
  0x21   : > { %p649_p0 = scmp.ne.s32.totalorder %s831_s6, %s648_s22  ;;  %s653_s27 = sshll.u32 %s731_s26, 4  ;;  %s654_s27 = int_to_ptr.vmem [resolvable:$false] %s653_s27 }
  0x22   : > { %s655_s28 = scalar_lea.vmem %s654_s27, 2048  ;;  %p656_p11 = scmp.lt.s32.totalorder %s831_s6, %s654_s27 }
  0x23   : > { %p651_p2 = pnand %p649_p0, %p635_p1  ;;  %p657_p4 = scmp.lt.s32.totalorder %s655_s28, %s648_s22 }
  0x25   : > { %p652_p12 = pneg %p651_p2  ;;  %p658_p5 = por %p657_p4, %p656_p11 }
  0x27   : > { %p659_p7 = pnand %p658_p5, %p652_p12 }
  0x29   : > { %662 = shalt.err (!%p659_p7)
}
  0x2a   : > { %s732_s29 = smov 256   ;;  %s733_s30 = smov 16  }
  0x2b   : > { %583 = dma.hbm_to_vmem [thread:$0]  (!%p827_p13), %s823_s4, 1024, %s831_s6, %s833_s8, %s732_s29, %s732_s29, %s733_s30  }
  0x2c   : > { %p534_p9 = scmp.ge.s32.totalorder %s729_s15, 1  ;;  %p156_p1 = scmp.lt.s32.totalorder %s729_s15, 3 }
  0x2e   : > { %p157_p3 = pnand %p534_p9, %p156_p1 }
  0x2f   : > { %s864_s5 = sand.u32 (!%p157_p3), 1, %s721_s13  }
  0x30   : > { %160 = sbr.rel (%p157_p3) target bundleno = 808 (0x328), region = 32  ;;  %s535_s9 = sshll.u32 (!%p157_p3), %s864_s5, 6 }
  0x31   : > { %s163_s10 = scalar_lea.sflag (!%p157_p3), [#allocation3], %s864_s5  ;;  %s166_s11 = scalar_lea.vmem (!%p157_p3), [#allocation2], %s535_s9 }
  0x37   : > { %708 = dma.done.wait (%p803_p6), %s163_s10, 1024  }
  0x38   : > { %710 = vsyncadd (%p803_p6), %s163_s10, 4294966272  ;;  %v874_v0 = vld [vmem:[%s166_s11] sm:$0xff]  ;;  %v876_v1 = vld [vmem:[%s166_s11 + $0x8] sm:$0xff]  ;;  %v734_v15 = vmov 0.0|0.0   ;;  %vm735_vm0 = vmmov 0   ;;  %v736_v19 = vmov 0.0   ;;  %v222_v20 = vlaneseq }
  0x39   : > { %v878_v2 = vld [vmem:[%s166_s11 + $0x20] sm:$0xff]  ;;  %v197_v3 = vadd.f32 %v876_v1, %v874_v0  ;;  %v882_v4 = vld [vmem:[%s166_s11 + $0x28] sm:$0xff]  ;;  %v884_v5 = vld [vmem:[%s166_s11 + $0x10] sm:$0xff]  ;;  %570 = vmatprep.subr.bf16.mxu0 %v734_v15  ;;  %562 = vmatprep.mubr.msk.f32.mxu0 %vm735_vm0, %v736_v19  ;;  %vm233_vm1 = vcmask 130112   ;;  %vm240_vm2 = vcmask 195712   ;;  %vm247_vm3 = vcmask 261312  }
  0x3a   : > { %v886_v6 = vld [vmem:[%s166_s11 + $0x18] sm:$0xff]  ;;  %v203_v7 = vadd.f32 %v882_v4, %v878_v2  ;;  %v890_v8 = vld [vmem:[%s166_s11 + $0x30] sm:$0xff]  ;;  %v213_v12 = vld [vmem:[%s974_s1] sm:$0xff]  ;;  %565 = vmatprep.subr.mxu1 %v736_v19  ;;  %567 = vmatprep.mubr.msk.f32.mxu1 %vm735_vm0, %v736_v19  ;;  %v223_v21 = vand.u32 127, %v222_v20  ;;  %v225_v22 = vshrl.u32 %v222_v20, 7  ;;  %vm249_vm4 = vcmask 261120  }
  0x3b   : > { %v892_v9 = vld [vmem:[%s166_s11 + $0x38] sm:$0xff]  ;;  %198 = vadd.xlane.f32.xlu0 %v197_v3  ;;  %v200_v10 = vadd.f32 %v886_v6, %v884_v5  ;;  %v214_v13 = vld [vmem:[%s974_s1 + $0x8] sm:$0xff]  ;;  %v215_v16 = vld [vmem:[%s974_s1 + $0x10] sm:$0xff]  ;;  %vm327_vm5 = vcmask 1041408   ;;  %vm323_vm6 = vcmask 15360   ;;  %s188_s27 = scalar_lea.vmem [#allocation5], %s535_s9 }
  0x3c   : > { %204 = vadd.xlane.f32.xlu1 %v203_v7  ;;  %v206_v11 = vadd.f32 %v892_v9, %v890_v8  ;;  %v571_v14 = vpack.c.bf16 %v214_v13, %v213_v12  ;;  %v216_v17 = vld [vmem:[%s974_s1 + $0x18] sm:$0xff]  ;;  %v228_v23 = vadd.s32 4294967288, %v223_v21  ;;  %v235_v25 = vadd.s32 4294967280, %v223_v21  ;;  %v217_v45 = vld [vmem:[%s975_s2] sm:$0x3]  ;;  %s455_s28 = sshll.u32 %s188_s27, 4  ;;  %s922_s28 = int_to_ptr.vmem [resolvable:$true] %s455_s28 }
  0x3d   : > { %v574_v18 = vpack.c.bf16 %v216_v17, %v215_v16  ;;  %v242_v26 = vadd.s32 4294967272, %v223_v21  ;;  %v226_v28 = vsub.s32 %v223_v21, %v225_v22  ;;  %566 = vmatpush3.msk.msra.mxu1 %vm327_vm5, %v217_v45  ;;  %v408_v55 = vsub.s32 0, %v225_v22  ;;  %s546_s29 = sshll.u32 %s781_s16, 10  ;;  %s442_s16 = scalar_lea.sflag [#allocation4], %s864_s5 }
  0x3e   : > { %572 = vmatpush3.bf16.msra.mxu0 %v571_v14  ;;  %v231_v30 = vsub.s32 %v228_v23, %v225_v22  ;;  %v238_v31 = vsub.s32 %v235_v25, %v225_v22  ;;  %s927_s10 = scalar_lea.hbm %s976_s3, %s546_s29  ;;  %s663_s11 = scalar_lea.vmem %s922_s28, 1024 }
  0x3f   : > { %201 = vadd.xlane.f32.xlu0 %v200_v10  ;;  %573 = vmatprep.subr.bf16.mxu0 %v734_v15  ;;  %v245_v34 = vsub.s32 %v242_v26, %v225_v22  ;;  %p664_p6 = scmp.ne.s32.totalorder %s922_s28, %s663_s11  ;;  %p983_p11 = scmp.ne.s32.totalorder %s980_s24, 0 }
  0x40   : > { %207 = vadd.xlane.f32.xlu1 %v206_v11  ;;  %s737_s23 = smov [#allocation5]  }
  0x41   : > { %p665_p12 = pnand %p664_p6, %p983_p11  ;;  %s667_s4 = sshll.u32 %s737_s23, 4  ;;  %s668_s4 = int_to_ptr.vmem [resolvable:$false] %s667_s4 }
  0x42   : > { %575 = vmatpush3.bf16.msra.mxu0 %v574_v18  ;;  %s669_s6 = scalar_lea.vmem %s668_s4, 2048  ;;  %p670_p8 = scmp.lt.s32.totalorder %s922_s28, %s668_s4 }
  0x43   : > { %p666_p13 = pneg %p665_p12  ;;  %p671_p10 = scmp.lt.s32.totalorder %s669_s6, %s663_s11 }
  0x45   : > { %p672_p0 = por %p671_p10, %p670_p8 }
  0x47   : > { %p673_p2 = pnand %p672_p0, %p666_p13 }
  0xc8   : > { %v199_v24 = vpop.xlane.xlu0 %198 }
  0xc9   : > { %v205_v27 = vpop.xlane.xlu1 %204  ;;  %v209_v29 = vmul.f32 0.00390625, %v199_v24 }
  0xca   : > { %v211_v32 = vmul.f32 0.00390625, %v205_v27 }
  0xcb   : > { %v227_v38 = vrot.slane %v209_v29, %v226_v28 }
  0xcc   : > { %v202_v33 = vpop.xlane.xlu0 %201  ;;  %v239_v40 = vrot.slane %v211_v32, %v238_v31 }
  0xcd   : > { %v210_v35 = vmul.f32 0.00390625, %v202_v33  ;;  %v208_v36 = vpop.xlane.xlu1 %207 }
  0xce   : > { %v212_v37 = vmul.f32 0.00390625, %v208_v36 }
  0xcf   : > { %v232_v39 = vrot.slane %v210_v35, %v231_v30 }
  0xd0   : > { %v246_v41 = vrot.slane %v212_v37, %v245_v34 }
  0xd1   : > { %v234_v42 = vsel %vm233_vm1, %v232_v39, %v227_v38 }
  0xd2   : > { %v241_v43 = vsel %vm240_vm2, %v239_v40, %v234_v42 }
  0xd3   : > { %v248_v44 = vsel %vm247_vm3, %v246_v41, %v241_v43 }
  0xd4   : > { %563 = vmatmul.mubr.msk.f32.vlgmr.msra.gmra.mrb[0].mxu0 %vm249_vm4, %v248_v44 }
 0x1a7   : > { %v318_v46 = vpop.f32.mrb[0].mxu0 }
 0x1a8   : > { %v322_v47 = vmax.f32 %v318_v46, 0.0  ;;  %v564_v48 = vpop.f32.mrb[1].mxu0 }
 0x1aa   : > { %568 = vmatmul.mubr.msk.f32.vlgmr.msra.gmra.mrb[0].mxu1 %vm323_vm6, %v322_v47 }
 0x27d   : > { %v397_v49 = vpop.f32.mrb[0].mxu1 }
 0x27e   : > { %v401_v50 = vsub.f32 0.0, %v397_v49  ;;  %v569_v51 = vpop.f32.mrb[1].mxu1 }
 0x280   : > { %v402_v52 = vmul.f32 1.442695, %v401_v50 }
 0x282   : > { %629 = vpow2.f32 %v402_v52 }
 0x28c   : > { %v630_v53 = vpop.eup %629 }
 0x28d   : > { %v404_v54 = vadd.f32 1.0, %v630_v53 }
 0x28f   : > { %631 = vrcp.f32 %v404_v54 }
 0x299   : > { %v632_v56 = vpop.eup %631 }
 0x29a   : > { %v409_v57 = vrot.slane %v632_v56, %v408_v55 }
 0x29c   : > { %415 = vbcast.lane.b32.xlu1 %v409_v57, 264  ;;  %411 = vbcast.lane.b32.xlu0 %v409_v57, 256 }
 0x2a0   : > { %419 = vbcast.lane.b32.xlu1 %v409_v57, 272 }
 0x2a4   : > { %423 = vbcast.lane.b32.xlu1 %v409_v57, 280 }
 0x30e   : > { %v416_v58 = vpop.permute.xlu1 %415  ;;  %v412_v59 = vpop.permute.xlu0 %411 }
 0x30f   : > { %v427_v60 = vmul.f32 %v416_v58, %v884_v5  ;;  %v428_v61 = vmul.f32 %v416_v58, %v886_v6  ;;  %v425_v62 = vmul.f32 %v412_v59, %v874_v0  ;;  %v426_v63 = vmul.f32 %v412_v59, %v876_v1 }
 0x311   : > { %435 = vst [vmem:[%s188_s27 + $0x10] sm:$0xff] %v427_v60  ;;  %436 = vst [vmem:[%s188_s27 + $0x18] sm:$0xff] %v428_v61 }
 0x312   : > { %433 = vst [vmem:[%s188_s27] sm:$0xff] %v425_v62  ;;  %434 = vst [vmem:[%s188_s27 + $0x8] sm:$0xff] %v426_v63  ;;  %v420_v3 = vpop.permute.xlu1 %419 }
 0x313   : > { %v429_v7 = vmul.f32 %v420_v3, %v878_v2  ;;  %v430_v5 = vmul.f32 %v420_v3, %v882_v4 }
 0x315   : > { %437 = vst [vmem:[%s188_s27 + $0x20] sm:$0xff] %v429_v7  ;;  %438 = vst [vmem:[%s188_s27 + $0x28] sm:$0xff] %v430_v5 }
 0x316   : > { %v424_v0 = vpop.permute.xlu1 %423 }
 0x317   : > { %v431_v1 = vmul.f32 %v424_v0, %v890_v8  ;;  %v432_v2 = vmul.f32 %v424_v0, %v892_v9 }
 0x319   : > { %439 = vst [vmem:[%s188_s27 + $0x30] sm:$0xff] %v431_v1  ;;  %440 = vst [vmem:[%s188_s27 + $0x38] sm:$0xff] %v432_v2 }
 0x31a   : > { %676 = shalt.err (!%p673_p2)
}
 0x31b   : > { %s677_s7 = scalar_lea.hbm %s927_s10, 1024  ;;  %s681_s19 = scalar_lea.hbm %s976_s3, 2048 }
 0x31c   : > { %p678_p4 = scmp.ne.s32.totalorder %s927_s10, %s677_s7  ;;  %p682_p9 = scmp.lt.u32.totalorder %s927_s10, %s976_s3 }
 0x31d   : > { %p683_p1 = scmp.lt.u32.totalorder %s681_s19, %s677_s7  ;;  %p685_p6 = scmp.lt.u32.totalorder %s677_s7, %s927_s10 }
 0x31e   : > { %p679_p5 = pnand %p678_p4, %p983_p11 }
 0x31f   : > { %p684_p3 = por %p683_p1, %p682_p9 }
 0x320   : > { %p680_p7 = pneg %p679_p5 }
 0x321   : > { %p686_p12 = por %p685_p6, %p684_p3 }
 0x323   : > { %p687_p13 = pnand %p686_p12, %p680_p7 }
 0x325   : > { %690 = shalt.err (!%p687_p13)
}
 0x326   : > { %s738_s26 = smov 256   ;;  %s739_s27 = smov 16  }
 0x327   : > { %578 = dma.vmem_to_hbm [thread:$0]  (%p983_p11), %s922_s28, 1024, %s927_s10, %s442_s16, %s738_s26, %s738_s26, %s739_s27  }
 0x328 PF: > { %s470_s29 = sand.u32 1, %s717_s12   ;;  %p984_p8 = scmp.ne.s32.totalorder %s981_s25, 0 }
 0x329   : > { %p985_p10 = scmp.ge.s32.totalorder %s729_s15, 2  ;;  %s471_s30 = scalar_lea.sflag [#allocation4], %s470_s29 }
 0x32b   : > { %p585_p0 = pnand %p985_p10, %p984_p8 }
 0x32d   : > { %712 = dma.done.wait (!%p585_p0), %s471_s30, 1024  }
 0x32e   : > { %714 = vsyncadd (!%p585_p0), %s471_s30, 4294966272  ;;  %p16_p2 = scmp.ge.s32.totalorder %s785_s18, 4   ;;  %s986_s12 = smov %s721_s13 }
 0x32f   : > { %s987_s13 = smov %s725_s14  ;;  %s988_s14 = smov %s797_s21 }
 0x330   : > { %s989_s15 = smov %s785_s18  ;;  %18 = sbr.rel (!%p16_p2) target bundleno = 5 (0x5), region = 77 }
 0x337   :  { %476 = vsyncpa [#allocation3], 1 }
 0x338   :  { %478 = vsyncpa [#allocation3 + $0x1], 1 }
 0x339   :  { %479 = vsyncpa [#allocation4], 1 }
 0x33a   :  { %481 = vsyncpa [#allocation4 + $0x1], 1 }

</bundles_post_ra>
